<compile_context>
chip_gen: v6e
topology: v6e:2x2x1
jax: 0.10.0
libtpu: 0.0.40
codegen_flags: <defaults>
</compile_context>

<pallas_src>
import jax
import jax.numpy as jnp
from jax import lax
from jax.experimental import pallas as pl
from jax.experimental.pallas import tpu as pltpu

NUM_UNITS = 32                    # cfg.num_units
NUM_BITS = 8                      # cfg.num_bits_per_vector
IN_CH = NUM_BITS + 1              # conv-prep input channels
BATCH = 2
SEQ = 8
GATES = 4 * NUM_UNITS             # 128 gate lanes, column order [i, f, o, u]
B_PAD = 8                         # batch rows padded to one full sublane group

# Parameter-slab row offsets (all multiples of 8 -> aligned static slices in-kernel).
ROW_WX = 0                        # rows [0, 128): folded wp @ wg_x in rows [0, IN_CH), rest 0
ROW_BX = 128                      # row 128     : bp @ wg_x + bg
ROW_WH = 136                      # rows [136, 264): wg_h in rows [136, 136+U), rest 0
ROW_WQ = 264                      # rows [264, 392): wq in rows [264, 264+U) cols [0, NUM_BITS), rest 0
ROW_BQ = 392                      # row 392     : bq in cols [0, NUM_BITS)
SLAB_ROWS = 400


def lstm_model_kernel(x_ref, w_ref, out_ref):
    """Whole forward pass in one kernel.

    x_ref   : (L*8, 128)  input sequence; row t*8+b, cols [0, IN_CH) real, rest zero
    w_ref   : (400, 128)  packed parameters (see ROW_* layout above)
    out_ref : (L*8, 128)  sigmoid(dens_post(h_t)); cols [0, NUM_BITS) real
    Gate column order is [input, forget, output, update].
    """
    LB, G = x_ref.shape
    R = B_PAD
    L = LB // R
    U = NUM_UNITS

    wx = w_ref[ROW_WX:ROW_WX + G, :]          # (128,128) folded prep + input-side gate weight
    bx = w_ref[ROW_BX:ROW_BX + 1, :]          # (1,128)
    wh = w_ref[ROW_WH:ROW_WH + G, :]          # (128,128) recurrent weight; rows >= U are zero
    wq = w_ref[ROW_WQ:ROW_WQ + G, :]          # (128,128) dens_post; rows >= U / cols >= NUM_BITS zero
    bq = w_ref[ROW_BQ:ROW_BQ + 1, :]          # (1,128)

    # Input-side gate pre-activations for ALL timesteps: one flattened MXU pass, off the chain.
    gx = jnp.dot(x_ref[...], wx, preferred_element_type=jnp.float32) + bx   # (L*8, 128)

    # Lane constants (hoisted): sigmoid lanes [i,f,o] via 0.5*tanh(g/2)+0.5, tanh lanes [u] as-is.
    lane = lax.broadcasted_iota(jnp.int32, (R, G), 1)
    is_sig = lane < 3 * U
    scale = jnp.where(is_sig, jnp.float32(0.5), jnp.float32(1.0))
    off = jnp.where(is_sig, jnp.float32(0.5), jnp.float32(0.0))

    h = jnp.zeros((R, G), jnp.float32)
    s = jnp.zeros((R, G), jnp.float32)
    hs = []
    # L is small & static -> fully unrolled; every per-step value is a single (8,128) vreg.
    for t in range(L):
        g = gx[t * R:(t + 1) * R, :] + jnp.dot(h, wh, preferred_element_type=jnp.float32)
        act = scale * jnp.tanh(scale * g) + off        # [sig(i), sig(f), sig(o), tanh(u)]
        x_f = pltpu.roll(act, shift=G - U, axis=1)     # forget slab -> lanes [0, U)
        x_o = pltpu.roll(act, shift=G - 2 * U, axis=1) # output slab -> lanes [0, U)
        x_u = pltpu.roll(act, shift=G - 3 * U, axis=1) # update slab -> lanes [0, U)
        s = x_f * s + act * x_u                        # act lanes [0, U) == sig(i)
        h = x_o * jnp.tanh(s)                          # only lanes [0, U) meaningful (rest finite junk)
        hs.append(h)

    # dens_post (1x1 conv) + output sigmoid, hoisted: one bulk matmul + one lane-dense store.
    h_all = jnp.concatenate(hs, axis=0)                # (L*8, 128)
    out_ref[...] = jax.nn.sigmoid(
        jnp.dot(h_all, wq, preferred_element_type=jnp.float32) + bq)


def pack_params(params):
    """Fold dens_prep into the gate matmul and pack everything into one (400, 128) slab."""
    wp, bp, wg, bg, wq, bq = params
    U = NUM_UNITS
    # The cell concatenates (h_tm1, prepped_input), hidden first.
    wg_h = wg[:U]                                      # (U, 4U)
    wg_x = wg[U:]                                      # (U, 4U)
    # (x @ wp + bp) @ wg_x + bg == x @ (wp @ wg_x) + (bp @ wg_x + bg)
    wx = wp @ wg_x                                     # (IN_CH, 4U)
    bx = bp @ wg_x + bg                                # (1, 4U)

    slab = jnp.zeros((SLAB_ROWS, GATES), jnp.float32)
    slab = slab.at[ROW_WX:ROW_WX + IN_CH, :].set(wx)
    slab = slab.at[ROW_BX, :].set(bx[0])
    slab = slab.at[ROW_WH:ROW_WH + U, :].set(wg_h)
    slab = slab.at[ROW_WQ:ROW_WQ + U, :NUM_BITS].set(wq)
    slab = slab.at[ROW_BQ, :NUM_BITS].set(bq[0])
    return slab


def lstm_model_forward(x_ncl, slab):
    """x_ncl: (B, IN_CH, L) float32 -> (B, NUM_BITS, L) float32."""
    B, C, L = x_ncl.shape
    x_lbc = jnp.transpose(x_ncl, (2, 0, 1)).astype(jnp.float32)          # (L, B, C)
    # Pad batch rows to a full sublane group and channels to 128 lanes -> unmasked in-kernel loads.
    x_pad = jnp.zeros((L, B_PAD, GATES), jnp.float32).at[:, :B, :C].set(x_lbc)
    x_pad = x_pad.reshape(L * B_PAD, GATES)

    out = pl.pallas_call(
        lstm_model_kernel,
        out_shape=jax.ShapeDtypeStruct((L * B_PAD, GATES), jnp.float32),
        in_specs=[pl.BlockSpec(memory_space=pltpu.MemorySpace.VMEM)] * 2,
        out_specs=pl.BlockSpec(memory_space=pltpu.MemorySpace.VMEM),
    )(x_pad, slab)

    out_lbq = out.reshape(L, B_PAD, GATES)[:, :B, :NUM_BITS]             # (L, B, NUM_BITS)
    return jnp.transpose(out_lbq, (1, 2, 0))                             # (B, NUM_BITS, L)


def init_params(key):
    """Deterministic init, shapes matching the PyTorch module (PyTorch-style uniform).

    Fused gate weight wg is (2U, 4U) with rows [h-side; x-side] and columns ordered
    [input, forget, output, update]. Real checkpoints would additionally need the Conv1d
    (out,in,1)->(in,out) and Linear transposes applied explicitly.
    """
    ks = jax.random.split(key, 12)
    U = NUM_UNITS

    def unif(k, shape, fan_in):
        bound = 1.0 / jnp.sqrt(fan_in)
        return jax.random.uniform(k, shape, jnp.float32, -bound, bound)

    # dens_prep: Conv1d(IN_CH, U, 1)  -> matmul weight (IN_CH, U)
    wp = unif(ks[0], (IN_CH, U), IN_CH)
    bp = unif(ks[1], (1, U), IN_CH)
    # LSTMCell: 4 x Linear(2U, U), fused into (2U, 4U) ordered [i, f, o, u]
    w_i = unif(ks[2], (2 * U, U), 2 * U)
    w_f = unif(ks[3], (2 * U, U), 2 * U)
    w_u = unif(ks[4], (2 * U, U), 2 * U)
    w_o = unif(ks[5], (2 * U, U), 2 * U)
    b_i = unif(ks[6], (1, U), 2 * U)
    b_f = unif(ks[7], (1, U), 2 * U)
    b_u = unif(ks[8], (1, U), 2 * U)
    b_o = unif(ks[9], (1, U), 2 * U)
    wg = jnp.concatenate([w_i, w_f, w_o, w_u], axis=1)
    bg = jnp.concatenate([b_i, b_f, b_o, b_u], axis=1)
    # dens_post: Conv1d(U, NUM_BITS, 1)
    wq = unif(ks[10], (U, NUM_BITS), U)
    bq = unif(ks[11], (1, NUM_BITS), U)
    return (wp, bp, wg, bg, wq, bq)


def reference_forward(x_ncl, params):
    """Pure-JAX reference mirroring the PyTorch forward (unfused), for validation."""
    wp, bp, wg, bg, wq, bq = params
    U = NUM_UNITS
    x_lbc = jnp.transpose(x_ncl, (2, 0, 1)).astype(jnp.float32)
    xp = jnp.einsum("lbc,cu->lbu", x_lbc, wp) + bp                        # dens_prep
    L, B, _ = xp.shape
    h = jnp.zeros((B, U), jnp.float32)
    s = jnp.zeros((B, U), jnp.float32)
    outs = []
    for t in range(L):
        cat = jnp.concatenate([h, xp[t]], axis=-1)                        # (hidden, input)
        gates = cat @ wg + bg
        x_i = jax.nn.sigmoid(gates[:, 0 * U:1 * U])
        x_f = jax.nn.sigmoid(gates[:, 1 * U:2 * U])
        x_o = jax.nn.sigmoid(gates[:, 2 * U:3 * U])
        x_u = jnp.tanh(gates[:, 3 * U:4 * U])
        s = x_f * s + x_i * x_u
        h = x_o * jnp.tanh(s)
        outs.append(jax.nn.sigmoid(h @ wq + bq))                          # dens_post + sigmoid
    out_lbq = jnp.stack(outs, axis=0)
    return jnp.transpose(out_lbq, (1, 2, 0))


if __name__ == "__main__":
    key = jax.random.PRNGKey(0)
    k_x, k_p = jax.random.split(key)
    x = jax.random.normal(k_x, (BATCH, IN_CH, SEQ), jnp.float32)          # NCL like PyTorch
    params = init_params(k_p)
    slab = pack_params(params)

    out = jax.jit(lstm_model_forward)(x, slab)
    out = jax.block_until_ready(out)

    ref = reference_forward(x, params)
    assert out.shape == (BATCH, NUM_BITS, SEQ)
    assert jnp.allclose(out, ref, atol=2e-5, rtol=2e-5), "mismatch vs reference"
    print("KERNEL_OK")
</pallas_src>

<mosaic_0001>
module attributes {stable_mosaic.version = 11 : i64} {
  func.func @lstm_model_kernel(%arg0: memref<64x128xf32, #tpu.memory_space<vmem>>, %arg1: memref<400x128xf32, #tpu.memory_space<vmem>>, %arg2: memref<64x128xf32, #tpu.memory_space<vmem>>) attributes {dimension_semantics = [], scalar_prefetch = 0 : i64, scratch_operands = 0 : i64, tpu.core_type = #tpu.core_type<tc>} {
    %c0 = arith.constant 0 : index
    %c0_0 = arith.constant 0 : index
    %0 = vector.load %arg1[%c0, %c0_0] : memref<400x128xf32, #tpu.memory_space<vmem>>, vector<128x128xf32>
    %c128 = arith.constant 128 : index
    %c0_1 = arith.constant 0 : index
    %1 = vector.load %arg1[%c128, %c0_1] : memref<400x128xf32, #tpu.memory_space<vmem>>, vector<1x128xf32>
    %c136 = arith.constant 136 : index
    %c0_2 = arith.constant 0 : index
    %2 = vector.load %arg1[%c136, %c0_2] : memref<400x128xf32, #tpu.memory_space<vmem>>, vector<128x128xf32>
    %c264 = arith.constant 264 : index
    %c0_3 = arith.constant 0 : index
    %3 = vector.load %arg1[%c264, %c0_3] : memref<400x128xf32, #tpu.memory_space<vmem>>, vector<128x128xf32>
    %c392 = arith.constant 392 : index
    %c0_4 = arith.constant 0 : index
    %4 = vector.load %arg1[%c392, %c0_4] : memref<400x128xf32, #tpu.memory_space<vmem>>, vector<1x128xf32>
    %c0_5 = arith.constant 0 : index
    %c0_6 = arith.constant 0 : index
    %5 = vector.load %arg0[%c0_5, %c0_6] : memref<64x128xf32, #tpu.memory_space<vmem>>, vector<64x128xf32>
    %cst = arith.constant dense<0.000000e+00> : vector<64x128xf32>
    %6 = tpu.matmul %5, %0, %cst {dimension_numbers = #tpu.dot_dimension_numbers<[1], [0], [0], [1], [0, 0, 1, 1], [], []>} : vector<64x128xf32>, vector<128x128xf32>, vector<64x128xf32> -> vector<64x128xf32>
    %7 = vector.broadcast %1 : vector<1x128xf32> to vector<64x128xf32>
    %8 = arith.addf %6, %7 : vector<64x128xf32>
    %9 = tpu.iota {dimensions = array<i32: 1>} : vector<8x128xi32>
    %c96_i32 = arith.constant 96 : i32
    %10 = vector.broadcast %c96_i32 : i32 to vector<8x128xi32>
    %11 = arith.cmpi slt, %9, %10 : vector<8x128xi32>
    %cst_7 = arith.constant 5.000000e-01 : f32
    %cst_8 = arith.constant 1.000000e+00 : f32
    %12 = vector.broadcast %cst_7 : f32 to vector<8x128xf32>
    %13 = vector.broadcast %cst_8 : f32 to vector<8x128xf32>
    %14 = arith.select %11, %12, %13 : vector<8x128xi1>, vector<8x128xf32>
    %cst_9 = arith.constant 5.000000e-01 : f32
    %cst_10 = arith.constant 0.000000e+00 : f32
    %15 = vector.broadcast %cst_9 : f32 to vector<8x128xf32>
    %16 = vector.broadcast %cst_10 : f32 to vector<8x128xf32>
    %17 = arith.select %11, %15, %16 : vector<8x128xi1>, vector<8x128xf32>
    %cst_11 = arith.constant 0.000000e+00 : f32
    %18 = vector.broadcast %cst_11 : f32 to vector<8x128xf32>
    %cst_12 = arith.constant 0.000000e+00 : f32
    %19 = vector.broadcast %cst_12 : f32 to vector<8x128xf32>
    %20 = vector.extract_strided_slice %8 {offsets = [0, 0], sizes = [8, 128], strides = [1, 1]} : vector<64x128xf32> to vector<8x128xf32>
    %cst_13 = arith.constant dense<0.000000e+00> : vector<8x128xf32>
    %21 = tpu.matmul %18, %2, %cst_13 {dimension_numbers = #tpu.dot_dimension_numbers<[1], [0], [0], [1], [0, 0, 1, 1], [], []>} : vector<8x128xf32>, vector<128x128xf32>, vector<8x128xf32> -> vector<8x128xf32>
    %22 = arith.addf %20, %21 : vector<8x128xf32>
    %23 = arith.mulf %14, %22 : vector<8x128xf32>
    %24 = math.tanh %23 : vector<8x128xf32>
    %25 = arith.mulf %14, %24 : vector<8x128xf32>
    %26 = arith.addf %25, %17 : vector<8x128xf32>
    %c96_i32_14 = arith.constant 96 : i32
    %27 = tpu.dynamic_rotate %26 by %c96_i32_14 dim 1 : vector<8x128xf32>, i32 -> vector<8x128xf32>
    %c64_i32 = arith.constant 64 : i32
    %28 = tpu.dynamic_rotate %26 by %c64_i32 dim 1 : vector<8x128xf32>, i32 -> vector<8x128xf32>
    %c32_i32 = arith.constant 32 : i32
    %29 = tpu.dynamic_rotate %26 by %c32_i32 dim 1 : vector<8x128xf32>, i32 -> vector<8x128xf32>
    %30 = arith.mulf %27, %19 : vector<8x128xf32>
    %31 = arith.mulf %26, %29 : vector<8x128xf32>
    %32 = arith.addf %30, %31 : vector<8x128xf32>
    %33 = math.tanh %32 : vector<8x128xf32>
    %34 = arith.mulf %28, %33 : vector<8x128xf32>
    %35 = vector.extract_strided_slice %8 {offsets = [8, 0], sizes = [8, 128], strides = [1, 1]} : vector<64x128xf32> to vector<8x128xf32>
    %cst_15 = arith.constant dense<0.000000e+00> : vector<8x128xf32>
    %36 = tpu.matmul %34, %2, %cst_15 {dimension_numbers = #tpu.dot_dimension_numbers<[1], [0], [0], [1], [0, 0, 1, 1], [], []>} : vector<8x128xf32>, vector<128x128xf32>, vector<8x128xf32> -> vector<8x128xf32>
    %37 = arith.addf %35, %36 : vector<8x128xf32>
    %38 = arith.mulf %14, %37 : vector<8x128xf32>
    %39 = math.tanh %38 : vector<8x128xf32>
    %40 = arith.mulf %14, %39 : vector<8x128xf32>
    %41 = arith.addf %40, %17 : vector<8x128xf32>
    %c96_i32_16 = arith.constant 96 : i32
    %42 = tpu.dynamic_rotate %41 by %c96_i32_16 dim 1 : vector<8x128xf32>, i32 -> vector<8x128xf32>
    %c64_i32_17 = arith.constant 64 : i32
    %43 = tpu.dynamic_rotate %41 by %c64_i32_17 dim 1 : vector<8x128xf32>, i32 -> vector<8x128xf32>
    %c32_i32_18 = arith.constant 32 : i32
    %44 = tpu.dynamic_rotate %41 by %c32_i32_18 dim 1 : vector<8x128xf32>, i32 -> vector<8x128xf32>
    %45 = arith.mulf %42, %32 : vector<8x128xf32>
    %46 = arith.mulf %41, %44 : vector<8x128xf32>
    %47 = arith.addf %45, %46 : vector<8x128xf32>
    %48 = math.tanh %47 : vector<8x128xf32>
    %49 = arith.mulf %43, %48 : vector<8x128xf32>
    %50 = vector.extract_strided_slice %8 {offsets = [16, 0], sizes = [8, 128], strides = [1, 1]} : vector<64x128xf32> to vector<8x128xf32>
    %cst_19 = arith.constant dense<0.000000e+00> : vector<8x128xf32>
    %51 = tpu.matmul %49, %2, %cst_19 {dimension_numbers = #tpu.dot_dimension_numbers<[1], [0], [0], [1], [0, 0, 1, 1], [], []>} : vector<8x128xf32>, vector<128x128xf32>, vector<8x128xf32> -> vector<8x128xf32>
    %52 = arith.addf %50, %51 : vector<8x128xf32>
    %53 = arith.mulf %14, %52 : vector<8x128xf32>
    %54 = math.tanh %53 : vector<8x128xf32>
    %55 = arith.mulf %14, %54 : vector<8x128xf32>
    %56 = arith.addf %55, %17 : vector<8x128xf32>
    %c96_i32_20 = arith.constant 96 : i32
    %57 = tpu.dynamic_rotate %56 by %c96_i32_20 dim 1 : vector<8x128xf32>, i32 -> vector<8x128xf32>
    %c64_i32_21 = arith.constant 64 : i32
    %58 = tpu.dynamic_rotate %56 by %c64_i32_21 dim 1 : vector<8x128xf32>, i32 -> vector<8x128xf32>
    %c32_i32_22 = arith.constant 32 : i32
    %59 = tpu.dynamic_rotate %56 by %c32_i32_22 dim 1 : vector<8x128xf32>, i32 -> vector<8x128xf32>
    %60 = arith.mulf %57, %47 : vector<8x128xf32>
    %61 = arith.mulf %56, %59 : vector<8x128xf32>
    %62 = arith.addf %60, %61 : vector<8x128xf32>
    %63 = math.tanh %62 : vector<8x128xf32>
    %64 = arith.mulf %58, %63 : vector<8x128xf32>
    %65 = vector.extract_strided_slice %8 {offsets = [24, 0], sizes = [8, 128], strides = [1, 1]} : vector<64x128xf32> to vector<8x128xf32>
    %cst_23 = arith.constant dense<0.000000e+00> : vector<8x128xf32>
    %66 = tpu.matmul %64, %2, %cst_23 {dimension_numbers = #tpu.dot_dimension_numbers<[1], [0], [0], [1], [0, 0, 1, 1], [], []>} : vector<8x128xf32>, vector<128x128xf32>, vector<8x128xf32> -> vector<8x128xf32>
    %67 = arith.addf %65, %66 : vector<8x128xf32>
    %68 = arith.mulf %14, %67 : vector<8x128xf32>
    %69 = math.tanh %68 : vector<8x128xf32>
    %70 = arith.mulf %14, %69 : vector<8x128xf32>
    %71 = arith.addf %70, %17 : vector<8x128xf32>
    %c96_i32_24 = arith.constant 96 : i32
    %72 = tpu.dynamic_rotate %71 by %c96_i32_24 dim 1 : vector<8x128xf32>, i32 -> vector<8x128xf32>
    %c64_i32_25 = arith.constant 64 : i32
    %73 = tpu.dynamic_rotate %71 by %c64_i32_25 dim 1 : vector<8x128xf32>, i32 -> vector<8x128xf32>
    %c32_i32_26 = arith.constant 32 : i32
    %74 = tpu.dynamic_rotate %71 by %c32_i32_26 dim 1 : vector<8x128xf32>, i32 -> vector<8x128xf32>
    %75 = arith.mulf %72, %62 : vector<8x128xf32>
    %76 = arith.mulf %71, %74 : vector<8x128xf32>
    %77 = arith.addf %75, %76 : vector<8x128xf32>
    %78 = math.tanh %77 : vector<8x128xf32>
    %79 = arith.mulf %73, %78 : vector<8x128xf32>
    %80 = vector.extract_strided_slice %8 {offsets = [32, 0], sizes = [8, 128], strides = [1, 1]} : vector<64x128xf32> to vector<8x128xf32>
    %cst_27 = arith.constant dense<0.000000e+00> : vector<8x128xf32>
    %81 = tpu.matmul %79, %2, %cst_27 {dimension_numbers = #tpu.dot_dimension_numbers<[1], [0], [0], [1], [0, 0, 1, 1], [], []>} : vector<8x128xf32>, vector<128x128xf32>, vector<8x128xf32> -> vector<8x128xf32>
    %82 = arith.addf %80, %81 : vector<8x128xf32>
    %83 = arith.mulf %14, %82 : vector<8x128xf32>
    %84 = math.tanh %83 : vector<8x128xf32>
    %85 = arith.mulf %14, %84 : vector<8x128xf32>
    %86 = arith.addf %85, %17 : vector<8x128xf32>
    %c96_i32_28 = arith.constant 96 : i32
    %87 = tpu.dynamic_rotate %86 by %c96_i32_28 dim 1 : vector<8x128xf32>, i32 -> vector<8x128xf32>
    %c64_i32_29 = arith.constant 64 : i32
    %88 = tpu.dynamic_rotate %86 by %c64_i32_29 dim 1 : vector<8x128xf32>, i32 -> vector<8x128xf32>
    %c32_i32_30 = arith.constant 32 : i32
    %89 = tpu.dynamic_rotate %86 by %c32_i32_30 dim 1 : vector<8x128xf32>, i32 -> vector<8x128xf32>
    %90 = arith.mulf %87, %77 : vector<8x128xf32>
    %91 = arith.mulf %86, %89 : vector<8x128xf32>
    %92 = arith.addf %90, %91 : vector<8x128xf32>
    %93 = math.tanh %92 : vector<8x128xf32>
    %94 = arith.mulf %88, %93 : vector<8x128xf32>
    %95 = vector.extract_strided_slice %8 {offsets = [40, 0], sizes = [8, 128], strides = [1, 1]} : vector<64x128xf32> to vector<8x128xf32>
    %cst_31 = arith.constant dense<0.000000e+00> : vector<8x128xf32>
    %96 = tpu.matmul %94, %2, %cst_31 {dimension_numbers = #tpu.dot_dimension_numbers<[1], [0], [0], [1], [0, 0, 1, 1], [], []>} : vector<8x128xf32>, vector<128x128xf32>, vector<8x128xf32> -> vector<8x128xf32>
    %97 = arith.addf %95, %96 : vector<8x128xf32>
    %98 = arith.mulf %14, %97 : vector<8x128xf32>
    %99 = math.tanh %98 : vector<8x128xf32>
    %100 = arith.mulf %14, %99 : vector<8x128xf32>
    %101 = arith.addf %100, %17 : vector<8x128xf32>
    %c96_i32_32 = arith.constant 96 : i32
    %102 = tpu.dynamic_rotate %101 by %c96_i32_32 dim 1 : vector<8x128xf32>, i32 -> vector<8x128xf32>
    %c64_i32_33 = arith.constant 64 : i32
    %103 = tpu.dynamic_rotate %101 by %c64_i32_33 dim 1 : vector<8x128xf32>, i32 -> vector<8x128xf32>
    %c32_i32_34 = arith.constant 32 : i32
    %104 = tpu.dynamic_rotate %101 by %c32_i32_34 dim 1 : vector<8x128xf32>, i32 -> vector<8x128xf32>
    %105 = arith.mulf %102, %92 : vector<8x128xf32>
    %106 = arith.mulf %101, %104 : vector<8x128xf32>
    %107 = arith.addf %105, %106 : vector<8x128xf32>
    %108 = math.tanh %107 : vector<8x128xf32>
    %109 = arith.mulf %103, %108 : vector<8x128xf32>
    %110 = vector.extract_strided_slice %8 {offsets = [48, 0], sizes = [8, 128], strides = [1, 1]} : vector<64x128xf32> to vector<8x128xf32>
    %cst_35 = arith.constant dense<0.000000e+00> : vector<8x128xf32>
    %111 = tpu.matmul %109, %2, %cst_35 {dimension_numbers = #tpu.dot_dimension_numbers<[1], [0], [0], [1], [0, 0, 1, 1], [], []>} : vector<8x128xf32>, vector<128x128xf32>, vector<8x128xf32> -> vector<8x128xf32>
    %112 = arith.addf %110, %111 : vector<8x128xf32>
    %113 = arith.mulf %14, %112 : vector<8x128xf32>
    %114 = math.tanh %113 : vector<8x128xf32>
    %115 = arith.mulf %14, %114 : vector<8x128xf32>
    %116 = arith.addf %115, %17 : vector<8x128xf32>
    %c96_i32_36 = arith.constant 96 : i32
    %117 = tpu.dynamic_rotate %116 by %c96_i32_36 dim 1 : vector<8x128xf32>, i32 -> vector<8x128xf32>
    %c64_i32_37 = arith.constant 64 : i32
    %118 = tpu.dynamic_rotate %116 by %c64_i32_37 dim 1 : vector<8x128xf32>, i32 -> vector<8x128xf32>
    %c32_i32_38 = arith.constant 32 : i32
    %119 = tpu.dynamic_rotate %116 by %c32_i32_38 dim 1 : vector<8x128xf32>, i32 -> vector<8x128xf32>
    %120 = arith.mulf %117, %107 : vector<8x128xf32>
    %121 = arith.mulf %116, %119 : vector<8x128xf32>
    %122 = arith.addf %120, %121 : vector<8x128xf32>
    %123 = math.tanh %122 : vector<8x128xf32>
    %124 = arith.mulf %118, %123 : vector<8x128xf32>
    %125 = vector.extract_strided_slice %8 {offsets = [56, 0], sizes = [8, 128], strides = [1, 1]} : vector<64x128xf32> to vector<8x128xf32>
    %cst_39 = arith.constant dense<0.000000e+00> : vector<8x128xf32>
    %126 = tpu.matmul %124, %2, %cst_39 {dimension_numbers = #tpu.dot_dimension_numbers<[1], [0], [0], [1], [0, 0, 1, 1], [], []>} : vector<8x128xf32>, vector<128x128xf32>, vector<8x128xf32> -> vector<8x128xf32>
    %127 = arith.addf %125, %126 : vector<8x128xf32>
    %128 = arith.mulf %14, %127 : vector<8x128xf32>
    %129 = math.tanh %128 : vector<8x128xf32>
    %130 = arith.mulf %14, %129 : vector<8x128xf32>
    %131 = arith.addf %130, %17 : vector<8x128xf32>
    %c96_i32_40 = arith.constant 96 : i32
    %132 = tpu.dynamic_rotate %131 by %c96_i32_40 dim 1 : vector<8x128xf32>, i32 -> vector<8x128xf32>
    %c64_i32_41 = arith.constant 64 : i32
    %133 = tpu.dynamic_rotate %131 by %c64_i32_41 dim 1 : vector<8x128xf32>, i32 -> vector<8x128xf32>
    %c32_i32_42 = arith.constant 32 : i32
    %134 = tpu.dynamic_rotate %131 by %c32_i32_42 dim 1 : vector<8x128xf32>, i32 -> vector<8x128xf32>
    %135 = arith.mulf %132, %122 : vector<8x128xf32>
    %136 = arith.mulf %131, %134 : vector<8x128xf32>
    %137 = arith.addf %135, %136 : vector<8x128xf32>
    %138 = math.tanh %137 : vector<8x128xf32>
    %139 = arith.mulf %133, %138 : vector<8x128xf32>
    %140 = tpu.concatenate %34, %49, %64, %79, %94, %109, %124, %139 in 0 : vector<8x128xf32>, vector<8x128xf32>, vector<8x128xf32>, vector<8x128xf32>, vector<8x128xf32>, vector<8x128xf32>, vector<8x128xf32>, vector<8x128xf32> -> vector<64x128xf32>
    %cst_43 = arith.constant dense<0.000000e+00> : vector<64x128xf32>
    %141 = tpu.matmul %140, %3, %cst_43 {dimension_numbers = #tpu.dot_dimension_numbers<[1], [0], [0], [1], [0, 0, 1, 1], [], []>} : vector<64x128xf32>, vector<128x128xf32>, vector<64x128xf32> -> vector<64x128xf32>
    %142 = vector.broadcast %4 : vector<1x128xf32> to vector<64x128xf32>
    %143 = arith.addf %141, %142 : vector<64x128xf32>
    %144 = arith.negf %143 : vector<64x128xf32>
    %145 = math.exp %144 : vector<64x128xf32>
    %cst_44 = arith.constant 1.000000e+00 : f32
    %146 = vector.broadcast %cst_44 : f32 to vector<64x128xf32>
    %147 = arith.addf %146, %145 : vector<64x128xf32>
    %148 = arith.divf %146, %147 : vector<64x128xf32>
    %c0_45 = arith.constant 0 : index
    %c0_46 = arith.constant 0 : index
    %149 = vector.load %arg2[%c0_45, %c0_46] : memref<64x128xf32, #tpu.memory_space<vmem>>, vector<64x128xf32>
    tpu.vector_store %arg2[%c0_45, %c0_46], %148 {strides = array<i32>} : memref<64x128xf32, #tpu.memory_space<vmem>>, vector<64x128xf32>,
    return
  }
}

</mosaic_0001>

<bundles_post_ra>
// kernel: lstm_model_forward.1
= control target key start
LH: loop header
LB: loop body
LE: loop exit
PB: predicated region body
PF: predicated region fallthrough
CT: control target
= control target key end

     0   :  { %7 = vsyncpa [#allocation3], 0  ;;  %s1712_s9 = smov [#allocation2]   ;;  %s2207_s0 = inlined_call_operand.vmem [shape: f32[64,128], index: 0, kind: input, shape index: {}]   ;;  %s2208_s1 = inlined_call_operand.hbm [shape: f32[400,128], index: 1, kind: input, shape index: {}]   ;;  %s2209_s2 = inlined_call_operand.vmem [shape: f32[64,128], index: 2, kind: output, shape index: {}]  }
   0x1   :  { %s15_s10 = sshll.u32 %s1712_s9, 4  ;;  %s16_s10 = int_to_ptr.vmem [resolvable:$true] %s15_s10 }
   0x2   :  { %s1698_s11 = scalar_lea.vmem %s16_s10, 6400  ;;  %p1703_p1 = scmp.lt.s32.totalorder %s16_s10, %s16_s10 }
   0x3   :  { %p1699_p0 = scmp.ne.s32.totalorder %s16_s10, %s1698_s11  ;;  %p1704_p2 = scmp.lt.s32.totalorder %s1698_s11, %s1698_s11 }
   0x5   :  { %p1705_p3 = por %p1704_p2, %p1703_p1 }
   0x7   :  { %p1706_p4 = pnand %p1705_p3, %p1699_p0 }
   0x9   :  { %1709 = shalt.err (!%p1706_p4)
}
   0xa   :  { %s1713_s12 = smov 128   ;;  %s1714_s13 = smov 8  }
   0xb   :  { %21 = dma.hbm_to_vmem [thread:$0]  %s2208_s1, 6400, %s16_s10, [#allocation3], %s1713_s12, %s1713_s12, %s1714_s13  }
   0xc   :  { %1710 = dma.done.wait [#allocation3], 6400  }
   0xd   :  { %1711 = vsyncadd [#allocation3], 4294960896  ;;  %v1715_v0 = vmov 0.0   ;;  %vm1716_vm0 = vmmov 0   ;;  %v40_v1 = vld [vmem:[#allocation2 + $0x78] sm:$0xff]  ;;  %v39_v2 = vld [vmem:[#allocation2 + $0x70] sm:$0xff]  ;;  %v192_v35 = vlaneseq }
   0xe   :  { %1293 = vmatprep.subr.mxu1 %v1715_v0  ;;  %1325 = vmatprep.mubr.msk.f32.mxu1 %vm1716_vm0, %v1715_v0  ;;  %v1742_v3 = vld [vmem:[#allocation2 + $0x100] sm:$0xff]  ;;  %v1745_v4 = vld [vmem:[#allocation2 + $0xf8] sm:$0xff]  ;;  %v38_v5 = vld [vmem:[#allocation2 + $0x68] sm:$0xff]  ;;  %v1717_v43 = vmov 1.0   ;;  %s1718_s29 = smov 64   ;;  %s1719_s30 = smov 96  }
   0xf   :  { %1249 = vmatprep.subr.mxu0 %v40_v1  ;;  %1294 = vmatpush3.msra.mxu1 %v1742_v3  ;;  %v1748_v6 = vld [vmem:[#allocation2 + $0xf0] sm:$0xff]  ;;  %v37_v7 = vld [vmem:[#allocation2 + $0x60] sm:$0xff]  ;;  %v1752_v8 = vld [vmem:[#allocation2 + $0xe8] sm:$0xff]  ;;  %v193_v36 = vand.u32 127, %v192_v35  ;;  %s1720_s5 = smov 32  }
  0x10   :  { %1250 = vmatpush3.msra.mxu0 %v40_v1  ;;  %1295 = vmatprep.subr.mxu1 %v1715_v0  ;;  %v36_v9 = vld [vmem:[#allocation2 + $0x58] sm:$0xff]  ;;  %v1756_v10 = vld [vmem:[#allocation2 + $0xe0] sm:$0xff]  ;;  %v35_v11 = vld [vmem:[#allocation2 + $0x50] sm:$0xff] }
  0x11   :  { %1251 = vmatprep.subr.mxu0 %v39_v2  ;;  %1296 = vmatpush3.msra.mxu1 %v1745_v4  ;;  %v1760_v12 = vld [vmem:[#allocation2 + $0xd8] sm:$0xff]  ;;  %v34_v13 = vld [vmem:[#allocation2 + $0x48] sm:$0xff]  ;;  %v1764_v14 = vld [vmem:[#allocation2 + $0xd0] sm:$0xff]  ;;  %vm194_vm1 = vcmp.lt.s32.totalorder %v193_v36, 96 }
  0x12   :  { %1252 = vmatpush3.msra.mxu0 %v39_v2  ;;  %1297 = vmatprep.subr.mxu1 %v1715_v0  ;;  %v33_v15 = vld [vmem:[#allocation2 + $0x40] sm:$0xff]  ;;  %v1768_v16 = vld [vmem:[#allocation2 + $0xc8] sm:$0xff]  ;;  %v32_v17 = vld [vmem:[#allocation2 + $0x38] sm:$0xff]  ;;  %v1885_v44 = vsel %vm194_vm1, 0.5, %v1717_v43  ;;  %v1889_v48 = vsel %vm194_vm1, 0.5, %v1715_v0 }
  0x13   :  { %1253 = vmatprep.subr.mxu0 %v38_v5  ;;  %1298 = vmatpush3.msra.mxu1 %v1748_v6  ;;  %v1772_v18 = vld [vmem:[#allocation2 + $0xc0] sm:$0xff]  ;;  %v31_v19 = vld [vmem:[#allocation2 + $0x30] sm:$0xff]  ;;  %v1776_v20 = vld [vmem:[#allocation2 + $0xb8] sm:$0xff] }
  0x14   :  { %1254 = vmatpush3.msra.mxu0 %v38_v5  ;;  %1299 = vmatprep.subr.mxu1 %v1715_v0  ;;  %v30_v21 = vld [vmem:[#allocation2 + $0x28] sm:$0xff]  ;;  %v1780_v22 = vld [vmem:[#allocation2 + $0xb0] sm:$0xff]  ;;  %v29_v23 = vld [vmem:[#allocation2 + $0x20] sm:$0xff] }
  0x15   :  { %1255 = vmatprep.subr.mxu0 %v37_v7  ;;  %1300 = vmatpush3.msra.mxu1 %v1752_v8  ;;  %v1784_v24 = vld [vmem:[#allocation2 + $0xa8] sm:$0xff]  ;;  %v28_v25 = vld [vmem:[#allocation2 + $0x18] sm:$0xff]  ;;  %v1788_v26 = vld [vmem:[#allocation2 + $0xa0] sm:$0xff] }
  0x16   :  { %1256 = vmatpush3.msra.mxu0 %v37_v7  ;;  %1301 = vmatprep.subr.mxu1 %v1715_v0  ;;  %v27_v27 = vld [vmem:[#allocation2 + $0x10] sm:$0xff]  ;;  %v1792_v28 = vld [vmem:[#allocation2 + $0x98] sm:$0xff]  ;;  %v26_v29 = vld [vmem:[#allocation2 + $0x8] sm:$0xff] }
  0x17   :  { %1257 = vmatprep.subr.mxu0 %v36_v9  ;;  %1302 = vmatpush3.msra.mxu1 %v1756_v10  ;;  %v75_v30 = vld [vmem:[%s2207_s0] sm:$0xff]  ;;  %v1800_v31 = vld [vmem:[#allocation2 + $0x90] sm:$0xff]  ;;  %v1803_v33 = vld [vmem:[#allocation2 + $0x88] sm:$0xff] }
  0x18   :  { %1258 = vmatpush3.msra.mxu0 %v36_v9  ;;  %1303 = vmatprep.subr.mxu1 %v1715_v0  ;;  %v25_v32 = vld [vmem:[#allocation2] sm:$0xff]  ;;  %v76_v34 = vld [vmem:[%s2207_s0 + $0x8] sm:$0xff]  ;;  %v77_v49 = vld [vmem:[%s2207_s0 + $0x10] sm:$0xff] }
  0x19   :  { %1259 = vmatprep.subr.mxu0 %v35_v11  ;;  %1304 = vmatpush3.msra.mxu1 %v1760_v12  ;;  %v1882_v39 = vld [vmem:[#allocation2 + $0x80] ss:$0 sm:$0xff]  ;;  %v78_v50 = vld [vmem:[%s2207_s0 + $0x18] sm:$0xff]  ;;  %v80_v54 = vld [vmem:[%s2207_s0 + $0x28] sm:$0xff] }
  0x1a   :  { %1260 = vmatpush3.msra.mxu0 %v35_v11  ;;  %1305 = vmatprep.subr.mxu1 %v1715_v0  ;;  %v79_v51 = vld [vmem:[%s2207_s0 + $0x20] sm:$0xff]  ;;  %v81_v55 = vld [vmem:[%s2207_s0 + $0x30] sm:$0xff]  ;;  %v82_v56 = vld [vmem:[%s2207_s0 + $0x38] sm:$0xff] }
  0x1b   :  { %1261 = vmatprep.subr.mxu0 %v34_v13  ;;  %1306 = vmatpush3.msra.mxu1 %v1764_v14 }
  0x1c   :  { %1262 = vmatpush3.msra.mxu0 %v34_v13  ;;  %1307 = vmatprep.subr.mxu1 %v1715_v0 }
  0x1d   :  { %1263 = vmatprep.subr.mxu0 %v33_v15  ;;  %1308 = vmatpush3.msra.mxu1 %v1768_v16 }
  0x1e   :  { %1264 = vmatpush3.msra.mxu0 %v33_v15  ;;  %1309 = vmatprep.subr.mxu1 %v1715_v0 }
  0x1f   :  { %1265 = vmatprep.subr.mxu0 %v32_v17  ;;  %1310 = vmatpush3.msra.mxu1 %v1772_v18 }
  0x20   :  { %1266 = vmatpush3.msra.mxu0 %v32_v17  ;;  %1311 = vmatprep.subr.mxu1 %v1715_v0 }
  0x21   :  { %1267 = vmatprep.subr.mxu0 %v31_v19  ;;  %1312 = vmatpush3.msra.mxu1 %v1776_v20 }
  0x22   :  { %1268 = vmatpush3.msra.mxu0 %v31_v19  ;;  %1313 = vmatprep.subr.mxu1 %v1715_v0 }
  0x23   :  { %1269 = vmatprep.subr.mxu0 %v30_v21  ;;  %1314 = vmatpush3.msra.mxu1 %v1780_v22 }
  0x24   :  { %1270 = vmatpush3.msra.mxu0 %v30_v21  ;;  %1315 = vmatprep.subr.mxu1 %v1715_v0 }
  0x25   :  { %1271 = vmatprep.subr.mxu0 %v29_v23  ;;  %1316 = vmatpush3.msra.mxu1 %v1784_v24 }
  0x26   :  { %1272 = vmatpush3.msra.mxu0 %v29_v23  ;;  %1317 = vmatprep.subr.mxu1 %v1715_v0 }
  0x27   :  { %1273 = vmatprep.subr.mxu0 %v28_v25  ;;  %1318 = vmatpush3.msra.mxu1 %v1788_v26 }
  0x28   :  { %1274 = vmatpush3.msra.mxu0 %v28_v25  ;;  %1319 = vmatprep.subr.mxu1 %v1715_v0 }
  0x29   :  { %1275 = vmatprep.subr.mxu0 %v27_v27  ;;  %1320 = vmatpush3.msra.mxu1 %v1792_v28 }
  0x2a   :  { %1276 = vmatpush3.msra.mxu0 %v27_v27  ;;  %1321 = vmatprep.subr.mxu1 %v1715_v0 }
  0x2b   :  { %1277 = vmatprep.subr.mxu0 %v26_v29  ;;  %1281 = vmatprep.mubr.f32.mxu0 %v75_v30 }
  0x2c   :  { %1278 = vmatpush3.msra.mxu0 %v26_v29  ;;  %1322 = vmatpush3.msra.mxu1 %v1800_v31 }
  0x2d   :  { %1279 = vmatprep.subr.mxu0 %v25_v32  ;;  %1323 = vmatprep.subr.mxu1 %v1715_v0 }
  0x2e   :  { %1280 = vmatpush3.msra.mxu0 %v25_v32  ;;  %1324 = vmatpush3.msra.mxu1 %v1803_v33 }
  0x2f   :  { %1282 = vmatmul.mubr.f32.vlgmr.msra.gmra.mxu0 %v76_v34  ;;  %1326 = vmatmul.mubr.f32.vlgmr.msra.gmra.mxu1 %v1715_v0 }
  0x30   :  { %1328 = vmatprep.subr.mxu0 %v1715_v0  ;;  %1363 = vmatprep.subr.mxu1 %v1715_v0 }
  0x31   :  { %1329 = vmatpush3.msra.mxu0 %v1742_v3  ;;  %1364 = vmatpush3.msra.mxu1 %v1742_v3 }
  0x32   :  { %1330 = vmatprep.subr.mxu0 %v1715_v0  ;;  %1365 = vmatprep.subr.mxu1 %v1715_v0 }
  0x33   :  { %1331 = vmatpush3.msra.mxu0 %v1745_v4  ;;  %1366 = vmatpush3.msra.mxu1 %v1745_v4 }
  0x34   :  { %1332 = vmatprep.subr.mxu0 %v1715_v0  ;;  %1367 = vmatprep.subr.mxu1 %v1715_v0 }
  0x35   :  { %1333 = vmatpush3.msra.mxu0 %v1748_v6  ;;  %1368 = vmatpush3.msra.mxu1 %v1748_v6 }
  0x36   :  { %1334 = vmatprep.subr.mxu0 %v1715_v0  ;;  %1369 = vmatprep.subr.mxu1 %v1715_v0 }
  0x37   :  { %1335 = vmatpush3.msra.mxu0 %v1752_v8  ;;  %1370 = vmatpush3.msra.mxu1 %v1752_v8 }
  0x38   :  { %1336 = vmatprep.subr.mxu0 %v1715_v0  ;;  %1371 = vmatprep.subr.mxu1 %v1715_v0 }
  0x39   :  { %1337 = vmatpush3.msra.mxu0 %v1756_v10  ;;  %1372 = vmatpush3.msra.mxu1 %v1756_v10 }
  0x3a   :  { %1338 = vmatprep.subr.mxu0 %v1715_v0  ;;  %1373 = vmatprep.subr.mxu1 %v1715_v0 }
  0x3b   :  { %1339 = vmatpush3.msra.mxu0 %v1760_v12  ;;  %1374 = vmatpush3.msra.mxu1 %v1760_v12 }
  0x3c   :  { %1340 = vmatprep.subr.mxu0 %v1715_v0  ;;  %1375 = vmatprep.subr.mxu1 %v1715_v0 }
  0x3d   :  { %1341 = vmatpush3.msra.mxu0 %v1764_v14  ;;  %1376 = vmatpush3.msra.mxu1 %v1764_v14 }
  0x3e   :  { %1342 = vmatprep.subr.mxu0 %v1715_v0  ;;  %1377 = vmatprep.subr.mxu1 %v1715_v0 }
  0x3f   :  { %1343 = vmatpush3.msra.mxu0 %v1768_v16  ;;  %1378 = vmatpush3.msra.mxu1 %v1768_v16 }
  0x40   :  { %1344 = vmatprep.subr.mxu0 %v1715_v0  ;;  %1379 = vmatprep.subr.mxu1 %v1715_v0 }
  0x41   :  { %1345 = vmatpush3.msra.mxu0 %v1772_v18  ;;  %1380 = vmatpush3.msra.mxu1 %v1772_v18 }
  0x42   :  { %1346 = vmatprep.subr.mxu0 %v1715_v0  ;;  %1381 = vmatprep.subr.mxu1 %v1715_v0 }
  0x43   :  { %1347 = vmatpush3.msra.mxu0 %v1776_v20  ;;  %1382 = vmatpush3.msra.mxu1 %v1776_v20 }
  0x44   :  { %1348 = vmatprep.subr.mxu0 %v1715_v0  ;;  %1383 = vmatprep.subr.mxu1 %v1715_v0 }
  0x45   :  { %1349 = vmatpush3.msra.mxu0 %v1780_v22  ;;  %1384 = vmatpush3.msra.mxu1 %v1780_v22 }
  0x46   :  { %1350 = vmatprep.subr.mxu0 %v1715_v0  ;;  %1385 = vmatprep.subr.mxu1 %v1715_v0 }
  0x47   :  { %1351 = vmatpush3.msra.mxu0 %v1784_v24  ;;  %1386 = vmatpush3.msra.mxu1 %v1784_v24 }
  0x48   :  { %1352 = vmatprep.subr.mxu0 %v1715_v0  ;;  %1387 = vmatprep.subr.mxu1 %v1715_v0 }
  0x49   :  { %1353 = vmatpush3.msra.mxu0 %v1788_v26  ;;  %1388 = vmatpush3.msra.mxu1 %v1788_v26 }
  0x4a   :  { %1354 = vmatprep.subr.mxu0 %v1715_v0  ;;  %1389 = vmatprep.subr.mxu1 %v1715_v0 }
  0x4b   :  { %1355 = vmatpush3.msra.mxu0 %v1792_v28  ;;  %1390 = vmatpush3.msra.mxu1 %v1792_v28 }
  0x4c   :  { %1356 = vmatprep.subr.mxu0 %v1715_v0  ;;  %1391 = vmatprep.subr.mxu1 %v1715_v0 }
  0x4d   :  { %1357 = vmatpush3.msra.mxu0 %v1800_v31  ;;  %1392 = vmatpush3.msra.mxu1 %v1800_v31 }
  0x4e   :  { %1358 = vmatprep.subr.mxu0 %v1715_v0  ;;  %1393 = vmatprep.subr.mxu1 %v1715_v0 }
  0x4f   :  { %1359 = vmatpush3.msra.mxu0 %v1803_v33  ;;  %1394 = vmatpush3.msra.mxu1 %v1803_v33 }
  0x50   :  { %1395 = vmatprep.mubr.msk.f32.mxu1 %vm1716_vm0, %v1715_v0  ;;  %1398 = vmatprep.subr.mxu0 %v1715_v0 }
  0x51   :  { %1433 = vmatprep.subr.mxu1 %v1715_v0  ;;  %1284 = vmatprep.mubr.f32.mxu0 %v77_v49 }
  0x52   :  { %1285 = vmatmul.mubr.f32.gmra.mxu0 %v78_v50 }
  0x53   :  { %1287 = vmatprep.mubr.f32.mxu0 %v79_v51 }
  0x56   :  { %1288 = vmatmul.mubr.f32.gmra.mxu0 %v80_v54 }
  0x57   :  { %1290 = vmatprep.mubr.f32.mxu0 %v81_v55 }
  0x5a   :  { %1291 = vmatmul.mubr.f32.gmra.mxu0 %v82_v56 }
  0x5b   :  { %1360 = vmatprep.mubr.msk.f32.mxu0 %vm1716_vm0, %v1715_v0 }
  0xef   :  { %v1880_v37 = vpop.f32.mrf.mxu0  ;;  %v263_v38 = vpop.f32.mrf.mxu1 }
  0xf0   :  { %v159_v15 = vadd.f32 %v1880_v37, %v1882_v39 }
  0xf1   :  { %v153_v40 = vpop.f32.mrf.mxu0  ;;  %v1327_v41 = vpop.f32.mrf.mxu1 }
  0xf2   :  { %v154_v42 = vadd.f32 %v1882_v39, %v153_v40 }
  0xf4   :  { %v267_v45 = vadd.f32 %v263_v38, %v154_v42 }
  0xf6   :  { %v268_v46 = vmul.f32 %v267_v45, %v1885_v44 }
  0xf8   :  { %1626 = vtanh.f32 %v268_v46 }
 0x105   :  { %v1627_v47 = vpop.eup %1626 }
 0x106   :  { %v270_v52 = vmul.f32 %v1627_v47, %v1885_v44 }
 0x108   :  { %v271_v53 = vadd.f32 %v270_v52, %v1889_v48 }
 0x10a   :  { %274 = vrot.lane.b32.xlu1 %v271_v53, %s1718_s29  ;;  %272 = vrot.lane.b32.xlu0 %v271_v53, %s1719_s30 }
 0x10e   :  { %276 = vrot.lane.b32.xlu0 %v271_v53, %s1720_s5 }
 0x112   :  { %v1953_v2 = vpop.f32.mrf.mxu0 }
 0x114   :  { %v163_v5 = vpop.f32.mrf.mxu0 }
 0x115   :  { %v164_v41 = vadd.f32 %v1882_v39, %v163_v5 }
 0x116   :  { %v1955_v7 = vpop.f32.mrf.mxu0 }
 0x118   :  { %v1957_v9 = vpop.f32.mrf.mxu0 }
 0x11a   :  { %v1959_v11 = vpop.f32.mrf.mxu0 }
 0x11c   :  { %v1961_v13 = vpop.f32.mrf.mxu0 }
 0x17c   :  { %v273_v57 = vpop.permute.xlu0 %272  ;;  %v275_v63 = vpop.permute.xlu1 %274 }
 0x17d   :  { %v278_v59 = vmul.f32 0.0, %v273_v57 }
 0x180   :  { %v277_v58 = vpop.permute.xlu0 %276 }
 0x181   :  { %v279_v60 = vmul.f32 %v277_v58, %v271_v53 }
 0x183   :  { %v280_v61 = vadd.f32 %v279_v60, %v278_v59  ;;  %v169_v59 = vadd.f32 %v1953_v2, %v1882_v39 }
 0x185   :  { %1628 = vtanh.f32 %v280_v61 }
 0x192   :  { %v1629_v62 = vpop.eup %1628 }
 0x193   :  { %v1916_v1 = vmul.f32 %v1629_v62, %v275_v63 }
 0x195   :  { %1361 = vmatmul.mubr.f32.vlgmr.msra.gmra.mxu0 %v1916_v1 }
 0x196   :  { %1399 = vmatpush3.msra.mxu0 %v1742_v3  ;;  %1430 = vmatprep.mubr.msk.f32.mxu0 %vm1716_vm0, %v1715_v0 }
 0x197   :  { %1400 = vmatprep.subr.mxu0 %v1715_v0 }
 0x198   :  { %1401 = vmatpush3.msra.mxu0 %v1745_v4 }
 0x199   :  { %1402 = vmatprep.subr.mxu0 %v1715_v0 }
 0x19a   :  { %1403 = vmatpush3.msra.mxu0 %v1748_v6 }
 0x19b   :  { %1404 = vmatprep.subr.mxu0 %v1715_v0 }
 0x19c   :  { %1405 = vmatpush3.msra.mxu0 %v1752_v8 }
 0x19d   :  { %1406 = vmatprep.subr.mxu0 %v1715_v0 }
 0x19e   :  { %1407 = vmatpush3.msra.mxu0 %v1756_v10 }
 0x19f   :  { %1408 = vmatprep.subr.mxu0 %v1715_v0 }
 0x1a0   :  { %1409 = vmatpush3.msra.mxu0 %v1760_v12 }
 0x1a1   :  { %1410 = vmatprep.subr.mxu0 %v1715_v0 }
 0x1a2   :  { %1411 = vmatpush3.msra.mxu0 %v1764_v14 }
 0x1a3   :  { %1412 = vmatprep.subr.mxu0 %v1715_v0 }
 0x1a4   :  { %1413 = vmatpush3.msra.mxu0 %v1768_v16 }
 0x1a5   :  { %1414 = vmatprep.subr.mxu0 %v1715_v0 }
 0x1a6   :  { %1415 = vmatpush3.msra.mxu0 %v1772_v18 }
 0x1a7   :  { %1416 = vmatprep.subr.mxu0 %v1715_v0 }
 0x1a8   :  { %1417 = vmatpush3.msra.mxu0 %v1776_v20 }
 0x1a9   :  { %1418 = vmatprep.subr.mxu0 %v1715_v0 }
 0x1aa   :  { %1419 = vmatpush3.msra.mxu0 %v1780_v22 }
 0x1ab   :  { %1420 = vmatprep.subr.mxu0 %v1715_v0 }
 0x1ac   :  { %1421 = vmatpush3.msra.mxu0 %v1784_v24 }
 0x1ad   :  { %1422 = vmatprep.subr.mxu0 %v1715_v0 }
 0x1ae   :  { %1423 = vmatpush3.msra.mxu0 %v1788_v26 }
 0x1af   :  { %1424 = vmatprep.subr.mxu0 %v1715_v0 }
 0x1b0   :  { %1425 = vmatpush3.msra.mxu0 %v1792_v28 }
 0x1b1   :  { %1426 = vmatprep.subr.mxu0 %v1715_v0 }
 0x1b2   :  { %1427 = vmatpush3.msra.mxu0 %v1800_v31 }
 0x1b3   :  { %1428 = vmatprep.subr.mxu0 %v1715_v0 }
 0x1b4   :  { %1429 = vmatpush3.msra.mxu0 %v1803_v33 }
 0x1b5   :  { %1468 = vmatprep.subr.mxu0 %v1715_v0 }
 0x255   :  { %v349_v17 = vpop.f32.mrf.mxu0 }
 0x256   :  { %v353_v19 = vadd.f32 %v349_v17, %v159_v15 }
 0x257   :  { %v1362_v21 = vpop.f32.mrf.mxu0 }
 0x258   :  { %v354_v23 = vmul.f32 %v353_v19, %v1885_v44 }
 0x25a   :  { %1630 = vtanh.f32 %v354_v23 }
 0x267   :  { %v1631_v25 = vpop.eup %1630 }
 0x268   :  { %v356_v27 = vmul.f32 %v1631_v25, %v1885_v44 }
 0x26a   :  { %v357_v29 = vadd.f32 %v356_v27, %v1889_v48 }
 0x26c   :  { %362 = vrot.lane.b32.xlu0 %v357_v29, %s1720_s5  ;;  %358 = vrot.lane.b32.xlu1 %v357_v29, %s1719_s30 }
 0x270   :  { %360 = vrot.lane.b32.xlu1 %v357_v29, %s1718_s29 }
 0x2de   :  { %v363_v30 = vpop.permute.xlu0 %362  ;;  %v359_v32 = vpop.permute.xlu1 %358 }
 0x2df   :  { %v365_v34 = vmul.f32 %v363_v30, %v357_v29  ;;  %v364_v35 = vmul.f32 %v359_v32, %v280_v61  ;;  %v174_v32 = vadd.f32 %v1882_v39, %v1957_v9 }
 0x2e1   :  { %v366_v36 = vadd.f32 %v365_v34, %v364_v35 }
 0x2e2   :  { %v361_v38 = vpop.permute.xlu1 %360 }
 0x2e3   :  { %1632 = vtanh.f32 %v366_v36 }
 0x2f0   :  { %v1633_v37 = vpop.eup %1632 }
 0x2f1   :  { %v1971_v40 = vmul.f32 %v1633_v37, %v361_v38 }
 0x2f3   :  { %1396 = vmatmul.mubr.f32.vlgmr.msra.gmra.mxu1 %v1971_v40 }
 0x2f4   :  { %1434 = vmatpush3.msra.mxu1 %v1742_v3  ;;  %1465 = vmatprep.mubr.msk.f32.mxu1 %vm1716_vm0, %v1715_v0 }
 0x2f5   :  { %1435 = vmatprep.subr.mxu1 %v1715_v0 }
 0x2f6   :  { %1436 = vmatpush3.msra.mxu1 %v1745_v4 }
 0x2f7   :  { %1437 = vmatprep.subr.mxu1 %v1715_v0 }
 0x2f8   :  { %1438 = vmatpush3.msra.mxu1 %v1748_v6 }
 0x2f9   :  { %1439 = vmatprep.subr.mxu1 %v1715_v0 }
 0x2fa   :  { %1440 = vmatpush3.msra.mxu1 %v1752_v8 }
 0x2fb   :  { %1441 = vmatprep.subr.mxu1 %v1715_v0 }
 0x2fc   :  { %1442 = vmatpush3.msra.mxu1 %v1756_v10 }
 0x2fd   :  { %1443 = vmatprep.subr.mxu1 %v1715_v0 }
 0x2fe   :  { %1444 = vmatpush3.msra.mxu1 %v1760_v12 }
 0x2ff   :  { %1445 = vmatprep.subr.mxu1 %v1715_v0 }
 0x300   :  { %1446 = vmatpush3.msra.mxu1 %v1764_v14 }
 0x301   :  { %1447 = vmatprep.subr.mxu1 %v1715_v0 }
 0x302   :  { %1448 = vmatpush3.msra.mxu1 %v1768_v16 }
 0x303   :  { %1449 = vmatprep.subr.mxu1 %v1715_v0 }
 0x304   :  { %1450 = vmatpush3.msra.mxu1 %v1772_v18 }
 0x305   :  { %1451 = vmatprep.subr.mxu1 %v1715_v0 }
 0x306   :  { %1452 = vmatpush3.msra.mxu1 %v1776_v20 }
 0x307   :  { %1453 = vmatprep.subr.mxu1 %v1715_v0 }
 0x308   :  { %1454 = vmatpush3.msra.mxu1 %v1780_v22 }
 0x309   :  { %1455 = vmatprep.subr.mxu1 %v1715_v0 }
 0x30a   :  { %1456 = vmatpush3.msra.mxu1 %v1784_v24 }
 0x30b   :  { %1457 = vmatprep.subr.mxu1 %v1715_v0 }
 0x30c   :  { %1458 = vmatpush3.msra.mxu1 %v1788_v26 }
 0x30d   :  { %1459 = vmatprep.subr.mxu1 %v1715_v0 }
 0x30e   :  { %1460 = vmatpush3.msra.mxu1 %v1792_v28 }
 0x30f   :  { %1461 = vmatprep.subr.mxu1 %v1715_v0 }
 0x310   :  { %1462 = vmatpush3.msra.mxu1 %v1800_v31 }
 0x311   :  { %1463 = vmatprep.subr.mxu1 %v1715_v0 }
 0x312   :  { %1464 = vmatpush3.msra.mxu1 %v1803_v33 }
 0x313   :  { %1503 = vmatprep.subr.mxu1 %v1715_v0 }
 0x3b3   :  { %v435_v42 = vpop.f32.mrf.mxu1 }
 0x3b4   :  { %v439_v43 = vadd.f32 %v435_v42, %v164_v41 }
 0x3b5   :  { %v1397_v45 = vpop.f32.mrf.mxu1 }
 0x3b6   :  { %v440_v46 = vmul.f32 %v439_v43, %v1885_v44 }
 0x3b8   :  { %1634 = vtanh.f32 %v440_v46 }
 0x3c5   :  { %v1635_v47 = vpop.eup %1634 }
 0x3c6   :  { %v442_v49 = vmul.f32 %v1635_v47, %v1885_v44 }
 0x3c8   :  { %v443_v50 = vadd.f32 %v442_v49, %v1889_v48 }
 0x3ca   :  { %448 = vrot.lane.b32.xlu1 %v443_v50, %s1720_s5  ;;  %444 = vrot.lane.b32.xlu0 %v443_v50, %s1719_s30 }
 0x3ce   :  { %446 = vrot.lane.b32.xlu0 %v443_v50, %s1718_s29 }
 0x43c   :  { %v449_v51 = vpop.permute.xlu1 %448  ;;  %v445_v52 = vpop.permute.xlu0 %444 }
 0x43d   :  { %v451_v53 = vmul.f32 %v449_v51, %v443_v50  ;;  %v450_v54 = vmul.f32 %v445_v52, %v366_v36  ;;  %v71_v52 = vld [vmem:[#allocation2 + $0x170] sm:$0xff] }
 0x43f   :  { %v452_v55 = vadd.f32 %v451_v53, %v450_v54  ;;  %v70_v53 = vld [vmem:[#allocation2 + $0x168] sm:$0xff]  ;;  %v69_v54 = vld [vmem:[#allocation2 + $0x160] sm:$0xff] }
 0x440   :  { %v447_v57 = vpop.permute.xlu0 %446 }
 0x441   :  { %1636 = vtanh.f32 %v452_v55 }
 0x44e   :  { %v1637_v56 = vpop.eup %1636 }
 0x44f   :  { %v2015_v58 = vmul.f32 %v1637_v56, %v447_v57  ;;  %v67_v56 = vld [vmem:[#allocation2 + $0x150] sm:$0xff]  ;;  %v66_v57 = vld [vmem:[#allocation2 + $0x148] sm:$0xff] }
 0x451   :  { %1431 = vmatmul.mubr.f32.vlgmr.msra.gmra.mxu0 %v2015_v58 }
 0x452   :  { %1469 = vmatpush3.msra.mxu0 %v1742_v3  ;;  %1500 = vmatprep.mubr.msk.f32.mxu0 %vm1716_vm0, %v1715_v0 }
 0x453   :  { %1470 = vmatprep.subr.mxu0 %v1715_v0 }
 0x454   :  { %1471 = vmatpush3.msra.mxu0 %v1745_v4 }
 0x455   :  { %1472 = vmatprep.subr.mxu0 %v1715_v0 }
 0x456   :  { %1473 = vmatpush3.msra.mxu0 %v1748_v6 }
 0x457   :  { %1474 = vmatprep.subr.mxu0 %v1715_v0 }
 0x458   :  { %1475 = vmatpush3.msra.mxu0 %v1752_v8 }
 0x459   :  { %1476 = vmatprep.subr.mxu0 %v1715_v0 }
 0x45a   :  { %1477 = vmatpush3.msra.mxu0 %v1756_v10 }
 0x45b   :  { %1478 = vmatprep.subr.mxu0 %v1715_v0 }
 0x45c   :  { %1479 = vmatpush3.msra.mxu0 %v1760_v12 }
 0x45d   :  { %1480 = vmatprep.subr.mxu0 %v1715_v0 }
 0x45e   :  { %1481 = vmatpush3.msra.mxu0 %v1764_v14 }
 0x45f   :  { %1482 = vmatprep.subr.mxu0 %v1715_v0 }
 0x460   :  { %1483 = vmatpush3.msra.mxu0 %v1768_v16 }
 0x461   :  { %1484 = vmatprep.subr.mxu0 %v1715_v0 }
 0x462   :  { %1485 = vmatpush3.msra.mxu0 %v1772_v18 }
 0x463   :  { %1486 = vmatprep.subr.mxu0 %v1715_v0 }
 0x464   :  { %1487 = vmatpush3.msra.mxu0 %v1776_v20 }
 0x465   :  { %1488 = vmatprep.subr.mxu0 %v1715_v0 }
 0x466   :  { %1489 = vmatpush3.msra.mxu0 %v1780_v22 }
 0x467   :  { %1490 = vmatprep.subr.mxu0 %v1715_v0 }
 0x468   :  { %1491 = vmatpush3.msra.mxu0 %v1784_v24 }
 0x469   :  { %1492 = vmatprep.subr.mxu0 %v1715_v0 }
 0x46a   :  { %1493 = vmatpush3.msra.mxu0 %v1788_v26 }
 0x46b   :  { %1494 = vmatprep.subr.mxu0 %v1715_v0 }
 0x46c   :  { %1495 = vmatpush3.msra.mxu0 %v1792_v28 }
 0x46d   :  { %1496 = vmatprep.subr.mxu0 %v1715_v0 }
 0x46e   :  { %1497 = vmatpush3.msra.mxu0 %v1800_v31 }
 0x46f   :  { %1498 = vmatprep.subr.mxu0 %v1715_v0 }
 0x470   :  { %1499 = vmatpush3.msra.mxu0 %v1803_v33 }
 0x471   :  { %1538 = vmatprep.subr.mxu0 %v1715_v0 }
 0x511   :  { %v521_v60 = vpop.f32.mrf.mxu0 }
 0x512   :  { %v525_v61 = vadd.f32 %v521_v60, %v169_v59  ;;  %v65_v59 = vld [vmem:[#allocation2 + $0x140] sm:$0xff]  ;;  %v63_v60 = vld [vmem:[#allocation2 + $0x130] sm:$0xff] }
 0x513   :  { %v1432_v62 = vpop.f32.mrf.mxu0 }
 0x514   :  { %v526_v63 = vmul.f32 %v525_v61, %v1885_v44  ;;  %v62_v61 = vld [vmem:[#allocation2 + $0x128] sm:$0xff]  ;;  %v61_v62 = vld [vmem:[#allocation2 + $0x120] sm:$0xff] }
 0x516   :  { %1638 = vtanh.f32 %v526_v63  ;;  %v60_v63 = vld [vmem:[#allocation2 + $0x118] sm:$0xff] }
 0x523   :  { %v1639_v5 = vpop.eup %1638 }
 0x524   :  { %v528_v15 = vmul.f32 %v1639_v5, %v1885_v44  ;;  %v59_v5 = vld [vmem:[#allocation2 + $0x110] sm:$0xff] }
 0x526   :  { %v529_v17 = vadd.f32 %v528_v15, %v1889_v48  ;;  %v58_v15 = vld [vmem:[#allocation2 + $0x108] sm:$0xff] }
 0x528   :  { %534 = vrot.lane.b32.xlu0 %v529_v17, %s1720_s5  ;;  %530 = vrot.lane.b32.xlu1 %v529_v17, %s1719_s30 }
 0x52c   :  { %532 = vrot.lane.b32.xlu1 %v529_v17, %s1718_s29 }
 0x59a   :  { %v535_v19 = vpop.permute.xlu0 %534  ;;  %v531_v21 = vpop.permute.xlu1 %530 }
 0x59b   :  { %v537_v2 = vmul.f32 %v535_v19, %v529_v17  ;;  %v536_v23 = vmul.f32 %v531_v21, %v452_v55  ;;  %v68_v55 = vld [vmem:[#allocation2 + $0x158] sm:$0xff]  ;;  %v184_v17 = vadd.f32 %v1882_v39, %v1961_v13 }
 0x59d   :  { %v538_v25 = vadd.f32 %v537_v2, %v536_v23 }
 0x59e   :  { %v533_v29 = vpop.permute.xlu1 %532 }
 0x59f   :  { %1640 = vtanh.f32 %v538_v25 }
 0x5ac   :  { %v1641_v27 = vpop.eup %1640 }
 0x5ad   :  { %v2060_v30 = vmul.f32 %v1641_v27, %v533_v29 }
 0x5af   :  { %1466 = vmatmul.mubr.f32.vlgmr.msra.gmra.mxu1 %v2060_v30 }
 0x5b0   :  { %1504 = vmatpush3.msra.mxu1 %v1742_v3  ;;  %1535 = vmatprep.mubr.msk.f32.mxu1 %vm1716_vm0, %v1715_v0 }
 0x5b1   :  { %1505 = vmatprep.subr.mxu1 %v1715_v0 }
 0x5b2   :  { %1506 = vmatpush3.msra.mxu1 %v1745_v4 }
 0x5b3   :  { %1507 = vmatprep.subr.mxu1 %v1715_v0 }
 0x5b4   :  { %1508 = vmatpush3.msra.mxu1 %v1748_v6 }
 0x5b5   :  { %1509 = vmatprep.subr.mxu1 %v1715_v0 }
 0x5b6   :  { %1510 = vmatpush3.msra.mxu1 %v1752_v8 }
 0x5b7   :  { %1511 = vmatprep.subr.mxu1 %v1715_v0 }
 0x5b8   :  { %1512 = vmatpush3.msra.mxu1 %v1756_v10 }
 0x5b9   :  { %1513 = vmatprep.subr.mxu1 %v1715_v0 }
 0x5ba   :  { %1514 = vmatpush3.msra.mxu1 %v1760_v12 }
 0x5bb   :  { %1515 = vmatprep.subr.mxu1 %v1715_v0 }
 0x5bc   :  { %1516 = vmatpush3.msra.mxu1 %v1764_v14 }
 0x5bd   :  { %1517 = vmatprep.subr.mxu1 %v1715_v0 }
 0x5be   :  { %1518 = vmatpush3.msra.mxu1 %v1768_v16 }
 0x5bf   :  { %1519 = vmatprep.subr.mxu1 %v1715_v0 }
 0x5c0   :  { %1520 = vmatpush3.msra.mxu1 %v1772_v18 }
 0x5c1   :  { %1521 = vmatprep.subr.mxu1 %v1715_v0 }
 0x5c2   :  { %1522 = vmatpush3.msra.mxu1 %v1776_v20 }
 0x5c3   :  { %1523 = vmatprep.subr.mxu1 %v1715_v0 }
 0x5c4   :  { %1524 = vmatpush3.msra.mxu1 %v1780_v22 }
 0x5c5   :  { %1525 = vmatprep.subr.mxu1 %v1715_v0 }
 0x5c6   :  { %1526 = vmatpush3.msra.mxu1 %v1784_v24 }
 0x5c7   :  { %1527 = vmatprep.subr.mxu1 %v1715_v0 }
 0x5c8   :  { %1528 = vmatpush3.msra.mxu1 %v1788_v26 }
 0x5c9   :  { %1529 = vmatprep.subr.mxu1 %v1715_v0 }
 0x5ca   :  { %1530 = vmatpush3.msra.mxu1 %v1792_v28 }
 0x5cb   :  { %1531 = vmatprep.subr.mxu1 %v1715_v0 }
 0x5cc   :  { %1532 = vmatpush3.msra.mxu1 %v1800_v31 }
 0x5cd   :  { %1533 = vmatprep.subr.mxu1 %v1715_v0 }
 0x5ce   :  { %1534 = vmatpush3.msra.mxu1 %v1803_v33 }
 0x66f   :  { %v607_v34 = vpop.f32.mrf.mxu1 }
 0x670   :  { %v611_v35 = vadd.f32 %v607_v34, %v174_v32 }
 0x671   :  { %v1467_v36 = vpop.f32.mrf.mxu1 }
 0x672   :  { %v612_v37 = vmul.f32 %v611_v35, %v1885_v44 }
 0x674   :  { %1642 = vtanh.f32 %v612_v37 }
 0x681   :  { %v1643_v38 = vpop.eup %1642 }
 0x682   :  { %v614_v41 = vmul.f32 %v1643_v38, %v1885_v44 }
 0x684   :  { %v615_v42 = vadd.f32 %v614_v41, %v1889_v48 }
 0x686   :  { %620 = vrot.lane.b32.xlu1 %v615_v42, %s1720_s5  ;;  %616 = vrot.lane.b32.xlu0 %v615_v42, %s1719_s30 }
 0x68a   :  { %618 = vrot.lane.b32.xlu0 %v615_v42, %s1718_s29 }
 0x6f8   :  { %v621_v43 = vpop.permute.xlu1 %620  ;;  %v617_v45 = vpop.permute.xlu0 %616 }
 0x6f9   :  { %v623_v9 = vmul.f32 %v621_v43, %v615_v42  ;;  %v622_v46 = vmul.f32 %v617_v45, %v538_v25 }
 0x6fb   :  { %v624_v47 = vadd.f32 %v623_v9, %v622_v46 }
 0x6fc   :  { %v619_v50 = vpop.permute.xlu0 %618 }
 0x6fd   :  { %1644 = vtanh.f32 %v624_v47 }
 0x70a   :  { %v1645_v49 = vpop.eup %1644 }
 0x70b   :  { %v2104_v51 = vmul.f32 %v1645_v49, %v619_v50 }
 0x70d   :  { %1501 = vmatmul.mubr.f32.vlgmr.msra.gmra.mxu0 %v2104_v51 }
 0x70e   :  { %1539 = vmatpush3.msra.mxu0 %v1742_v3  ;;  %1570 = vmatprep.mubr.msk.f32.mxu0 %vm1716_vm0, %v1715_v0  ;;  %v179_v3 = vadd.f32 %v1955_v7, %v1882_v39  ;;  %v72_v7 = vld [vmem:[#allocation2 + $0x178] sm:$0xff] }
 0x70f   :  { %1540 = vmatprep.subr.mxu0 %v1715_v0 }
 0x710   :  { %1541 = vmatpush3.msra.mxu0 %v1745_v4 }
 0x711   :  { %1542 = vmatprep.subr.mxu0 %v1715_v0 }
 0x712   :  { %1543 = vmatpush3.msra.mxu0 %v1748_v6 }
 0x713   :  { %1544 = vmatprep.subr.mxu0 %v1715_v0 }
 0x714   :  { %1545 = vmatpush3.msra.mxu0 %v1752_v8 }
 0x715   :  { %1546 = vmatprep.subr.mxu0 %v1715_v0 }
 0x716   :  { %1547 = vmatpush3.msra.mxu0 %v1756_v10 }
 0x717   :  { %1548 = vmatprep.subr.mxu0 %v1715_v0 }
 0x718   :  { %1549 = vmatpush3.msra.mxu0 %v1760_v12 }
 0x719   :  { %1550 = vmatprep.subr.mxu0 %v1715_v0 }
 0x71a   :  { %1551 = vmatpush3.msra.mxu0 %v1764_v14 }
 0x71b   :  { %1552 = vmatprep.subr.mxu0 %v1715_v0 }
 0x71c   :  { %1553 = vmatpush3.msra.mxu0 %v1768_v16 }
 0x71d   :  { %1554 = vmatprep.subr.mxu0 %v1715_v0 }
 0x71e   :  { %1555 = vmatpush3.msra.mxu0 %v1772_v18 }
 0x71f   :  { %1556 = vmatprep.subr.mxu0 %v1715_v0 }
 0x720   :  { %1557 = vmatpush3.msra.mxu0 %v1776_v20 }
 0x721   :  { %1558 = vmatprep.subr.mxu0 %v1715_v0 }
 0x722   :  { %1559 = vmatpush3.msra.mxu0 %v1780_v22 }
 0x723   :  { %1560 = vmatprep.subr.mxu0 %v1715_v0 }
 0x724   :  { %1561 = vmatpush3.msra.mxu0 %v1784_v24 }
 0x725   :  { %1562 = vmatprep.subr.mxu0 %v1715_v0 }
 0x726   :  { %1563 = vmatpush3.msra.mxu0 %v1788_v26 }
 0x727   :  { %1564 = vmatprep.subr.mxu0 %v1715_v0 }
 0x728   :  { %1565 = vmatpush3.msra.mxu0 %v1792_v28 }
 0x729   :  { %1566 = vmatprep.subr.mxu0 %v1715_v0 }
 0x72a   :  { %1567 = vmatpush3.msra.mxu0 %v1800_v31 }
 0x72b   :  { %1568 = vmatprep.subr.mxu0 %v1715_v0  ;;  %v73_v0 = vld [vmem:[#allocation2 + $0x180] sm:$0xff] }
 0x72c   :  { %1569 = vmatpush3.msra.mxu0 %v1803_v33  ;;  %1573 = vmatprep.subr.mxu1 %v73_v0 }
 0x7cd   :  { %v693_v4 = vpop.f32.mrf.mxu0 }
 0x7ce   :  { %v697_v6 = vadd.f32 %v693_v4, %v179_v3 }
 0x7cf   :  { %v1502_v8 = vpop.f32.mrf.mxu0 }
 0x7d0   :  { %v698_v10 = vmul.f32 %v697_v6, %v1885_v44 }
 0x7d2   :  { %1646 = vtanh.f32 %v698_v10 }
 0x7df   :  { %v1647_v12 = vpop.eup %1646 }
 0x7e0   :  { %v700_v14 = vmul.f32 %v1647_v12, %v1885_v44 }
 0x7e2   :  { %v701_v16 = vadd.f32 %v700_v14, %v1889_v48 }
 0x7e4   :  { %706 = vrot.lane.b32.xlu0 %v701_v16, %s1720_s5  ;;  %702 = vrot.lane.b32.xlu1 %v701_v16, %s1719_s30 }
 0x7e8   :  { %704 = vrot.lane.b32.xlu1 %v701_v16, %s1718_s29 }
 0x856   :  { %v707_v18 = vpop.permute.xlu0 %706  ;;  %v703_v20 = vpop.permute.xlu1 %702 }
 0x857   :  { %v709_v22 = vmul.f32 %v707_v18, %v701_v16  ;;  %v708_v24 = vmul.f32 %v703_v20, %v624_v47 }
 0x859   :  { %v2148_v26 = vadd.f32 %v709_v22, %v708_v24 }
 0x85a   :  { %v705_v31 = vpop.permute.xlu1 %704 }
 0x85b   :  { %1648 = vtanh.f32 %v2148_v26 }
 0x868   :  { %v1649_v28 = vpop.eup %1648 }
 0x869   :  { %v712_v33 = vmul.f32 %v1649_v28, %v705_v31 }
 0x86b   :  { %1536 = vmatmul.mubr.f32.vlgmr.msra.gmra.mxu1 %v712_v33 }
 0x86c   :  { %1574 = vmatpush3.msra.mxu1 %v73_v0  ;;  %1605 = vmatprep.mubr.f32.mxu1 %v1916_v1  ;;  %v64_v1 = vld [vmem:[#allocation2 + $0x138] sm:$0xff] }
 0x86d   :  { %1575 = vmatprep.subr.mxu1 %v72_v7 }
 0x86e   :  { %1576 = vmatpush3.msra.mxu1 %v72_v7 }
 0x86f   :  { %1577 = vmatprep.subr.mxu1 %v71_v52 }
 0x870   :  { %1578 = vmatpush3.msra.mxu1 %v71_v52 }
 0x871   :  { %1579 = vmatprep.subr.mxu1 %v70_v53 }
 0x872   :  { %1580 = vmatpush3.msra.mxu1 %v70_v53 }
 0x873   :  { %1581 = vmatprep.subr.mxu1 %v69_v54 }
 0x874   :  { %1582 = vmatpush3.msra.mxu1 %v69_v54 }
 0x875   :  { %1583 = vmatprep.subr.mxu1 %v68_v55 }
 0x876   :  { %1584 = vmatpush3.msra.mxu1 %v68_v55 }
 0x877   :  { %1585 = vmatprep.subr.mxu1 %v67_v56 }
 0x878   :  { %1586 = vmatpush3.msra.mxu1 %v67_v56 }
 0x879   :  { %1587 = vmatprep.subr.mxu1 %v66_v57 }
 0x87a   :  { %1588 = vmatpush3.msra.mxu1 %v66_v57 }
 0x87b   :  { %1589 = vmatprep.subr.mxu1 %v65_v59 }
 0x87c   :  { %1590 = vmatpush3.msra.mxu1 %v65_v59 }
 0x87d   :  { %1591 = vmatprep.subr.mxu1 %v64_v1 }
 0x87e   :  { %1592 = vmatpush3.msra.mxu1 %v64_v1 }
 0x87f   :  { %1593 = vmatprep.subr.mxu1 %v63_v60 }
 0x880   :  { %1594 = vmatpush3.msra.mxu1 %v63_v60  ;;  %v189_v60 = vadd.f32 %v1959_v11, %v1882_v39 }
 0x881   :  { %1595 = vmatprep.subr.mxu1 %v62_v61 }
 0x882   :  { %1596 = vmatpush3.msra.mxu1 %v62_v61 }
 0x883   :  { %1597 = vmatprep.subr.mxu1 %v61_v62 }
 0x884   :  { %1598 = vmatpush3.msra.mxu1 %v61_v62 }
 0x885   :  { %1599 = vmatprep.subr.mxu1 %v60_v63 }
 0x886   :  { %1600 = vmatpush3.msra.mxu1 %v60_v63 }
 0x887   :  { %1601 = vmatprep.subr.mxu1 %v59_v5 }
 0x888   :  { %1602 = vmatpush3.msra.mxu1 %v59_v5 }
 0x889   :  { %1603 = vmatprep.subr.mxu1 %v58_v15 }
 0x88a   :  { %1604 = vmatpush3.msra.mxu1 %v58_v15 }
 0x88b   :  { %1606 = vmatmul.mubr.f32.vlgmr.msra.gmra.mxu1 %v1971_v40 }
 0x88c   :  { %1608 = vmatprep.mubr.f32.mxu1 %v2015_v58  ;;  %v2164_v58 = vld [vmem:[#allocation2 + $0x188] ss:$0 sm:$0xff] }
 0x88f   :  { %1609 = vmatmul.mubr.f32.gmra.mxu1 %v2060_v30 }
 0x890   :  { %1611 = vmatprep.mubr.f32.mxu1 %v2104_v51 }
 0x893   :  { %1612 = vmatmul.mubr.f32.gmra.mxu1 %v712_v33 }
 0x92b   :  { %v779_v19 = vpop.f32.mrf.mxu1 }
 0x92c   :  { %v783_v21 = vadd.f32 %v779_v19, %v184_v17 }
 0x92d   :  { %v1537_v2 = vpop.f32.mrf.mxu1 }
 0x92e   :  { %v784_v23 = vmul.f32 %v783_v21, %v1885_v44 }
 0x930   :  { %1650 = vtanh.f32 %v784_v23 }
 0x93d   :  { %v1651_v25 = vpop.eup %1650 }
 0x93e   :  { %v786_v27 = vmul.f32 %v1651_v25, %v1885_v44 }
 0x940   :  { %v787_v40 = vadd.f32 %v786_v27, %v1889_v48 }
 0x942   :  { %792 = vrot.lane.b32.xlu1 %v787_v40, %s1720_s5  ;;  %788 = vrot.lane.b32.xlu0 %v787_v40, %s1719_s30 }
 0x946   :  { %790 = vrot.lane.b32.xlu0 %v787_v40, %s1718_s29 }
 0x94b   :  { %v1607_v13 = vpop.f32.mrf.mxu1 }
 0x94c   :  { %v961_v29 = vadd.f32 %v1607_v13, %v2164_v58 }
 0x94d   :  { %v955_v30 = vpop.f32.mrf.mxu1 }
 0x94e   :  { %v1058_v32 = vmul.f32 -1.442695, %v961_v29  ;;  %v956_v34 = vadd.f32 %v2164_v58, %v955_v30 }
 0x94f   :  { %v1610_v35 = vpop.f32.mrf.mxu1 }
 0x950   :  { %1652 = vpow2.f32 %v1058_v32  ;;  %v1057_v36 = vmul.f32 -1.442695, %v956_v34  ;;  %v971_v37 = vadd.f32 %v1610_v35, %v2164_v58 }
 0x951   :  { %v965_v38 = vpop.f32.mrf.mxu1 }
 0x952   :  { %1654 = vpow2.f32 %v1057_v36  ;;  %v1060_v41 = vmul.f32 -1.442695, %v971_v37  ;;  %v966_v42 = vadd.f32 %v2164_v58, %v965_v38 }
 0x953   :  { %v1613_v43 = vpop.f32.mrf.mxu1 }
 0x954   :  { %1656 = vpow2.f32 %v1060_v41  ;;  %v1059_v45 = vmul.f32 -1.442695, %v966_v42  ;;  %v981_v9 = vadd.f32 %v1613_v43, %v2164_v58 }
 0x955   :  { %v975_v46 = vpop.f32.mrf.mxu1 }
 0x956   :  { %1658 = vpow2.f32 %v1059_v45  ;;  %v1062_v47 = vmul.f32 -1.442695, %v981_v9  ;;  %v976_v49 = vadd.f32 %v2164_v58, %v975_v46 }
 0x958   :  { %1660 = vpow2.f32 %v1062_v47  ;;  %v1061_v50 = vmul.f32 -1.442695, %v976_v49 }
 0x95a   :  { %1662 = vpow2.f32 %v1061_v50 }
 0x95d   :  { %v1653_v51 = vpop.eup %1652 }
 0x95e   :  { %v1019_v3 = vadd.f32 1.0, %v1653_v51 }
 0x95f   :  { %v1655_v4 = vpop.eup %1654 }
 0x960   :  { %1664 = vrcp.f32 %v1019_v3  ;;  %v1018_v6 = vadd.f32 1.0, %v1655_v4 }
 0x961   :  { %v1657_v8 = vpop.eup %1656 }
 0x962   :  { %1666 = vrcp.f32 %v1018_v6  ;;  %v1021_v10 = vadd.f32 1.0, %v1657_v8 }
 0x963   :  { %v1659_v12 = vpop.eup %1658 }
 0x964   :  { %1668 = vrcp.f32 %v1021_v10  ;;  %v1020_v14 = vadd.f32 1.0, %v1659_v12 }
 0x965   :  { %v1661_v16 = vpop.eup %1660 }
 0x966   :  { %1670 = vrcp.f32 %v1020_v14  ;;  %v1023_v0 = vadd.f32 1.0, %v1661_v16 }
 0x967   :  { %v1663_v18 = vpop.eup %1662 }
 0x968   :  { %1672 = vrcp.f32 %v1023_v0  ;;  %v1022_v20 = vadd.f32 1.0, %v1663_v18 }
 0x96a   :  { %1674 = vrcp.f32 %v1022_v20 }
 0x96d   :  { %v1665_v22 = vpop.eup %1664 }
 0x96e   :  { %1043 = vst [vmem:[%s2209_s2 + $0x8] sm:$0xff] %v1665_v22 }
 0x96f   :  { %v1667_v24 = vpop.eup %1666 }
 0x970   :  { %1042 = vst [vmem:[%s2209_s2] sm:$0xff] %v1667_v24 }
 0x971   :  { %v1669_v28 = vpop.eup %1668 }
 0x972   :  { %1045 = vst [vmem:[%s2209_s2 + $0x18] sm:$0xff] %v1669_v28 }
 0x973   :  { %v1671_v31 = vpop.eup %1670 }
 0x974   :  { %1044 = vst [vmem:[%s2209_s2 + $0x10] sm:$0xff] %v1671_v31 }
 0x975   :  { %v1673_v33 = vpop.eup %1672 }
 0x976   :  { %1047 = vst [vmem:[%s2209_s2 + $0x28] sm:$0xff] %v1673_v33 }
 0x977   :  { %v1675_v7 = vpop.eup %1674 }
 0x978   :  { %1046 = vst [vmem:[%s2209_s2 + $0x20] sm:$0xff] %v1675_v7 }
 0x9b4   :  { %v793_v52 = vpop.permute.xlu1 %792  ;;  %v789_v53 = vpop.permute.xlu0 %788 }
 0x9b5   :  { %v795_v54 = vmul.f32 %v793_v52, %v787_v40  ;;  %v794_v55 = vmul.f32 %v789_v53, %v2148_v26 }
 0x9b7   :  { %v796_v56 = vadd.f32 %v795_v54, %v794_v55 }
 0x9b8   :  { %v791_v59 = vpop.permute.xlu0 %790 }
 0x9b9   :  { %1676 = vtanh.f32 %v796_v56 }
 0x9c6   :  { %v1677_v57 = vpop.eup %1676 }
 0x9c7   :  { %v798_v1 = vmul.f32 %v1677_v57, %v791_v59 }
 0x9c9   :  { %1571 = vmatmul.mubr.f32.vlgmr.msra.gmra.mxu0 %v798_v1  ;;  %1614 = vmatprep.mubr.f32.mxu1 %v798_v1 }
 0xa89   :  { %v865_v61 = vpop.f32.mrf.mxu0 }
 0xa8a   :  { %v869_v62 = vadd.f32 %v865_v61, %v189_v60 }
 0xa8b   :  { %v1572_v63 = vpop.f32.mrf.mxu0 }
 0xa8c   :  { %v870_v5 = vmul.f32 %v869_v62, %v1885_v44 }
 0xa8e   :  { %1678 = vtanh.f32 %v870_v5 }
 0xa9b   :  { %v1679_v15 = vpop.eup %1678 }
 0xa9c   :  { %v872_v17 = vmul.f32 %v1679_v15, %v1885_v44 }
 0xa9e   :  { %v873_v26 = vadd.f32 %v872_v17, %v1889_v48 }
 0xaa0   :  { %878 = vrot.lane.b32.xlu0 %v873_v26, %s1720_s5  ;;  %874 = vrot.lane.b32.xlu1 %v873_v26, %s1719_s30 }
 0xaa4   :  { %876 = vrot.lane.b32.xlu1 %v873_v26, %s1718_s29 }
 0xb12   :  { %v879_v19 = vpop.permute.xlu0 %878  ;;  %v875_v21 = vpop.permute.xlu1 %874 }
 0xb13   :  { %v881_v39 = vmul.f32 %v879_v19, %v873_v26  ;;  %v880_v11 = vmul.f32 %v875_v21, %v796_v56 }
 0xb15   :  { %v882_v2 = vadd.f32 %v881_v39, %v880_v11 }
 0xb16   :  { %v877_v25 = vpop.permute.xlu1 %876 }
 0xb17   :  { %1680 = vtanh.f32 %v882_v2 }
 0xb24   :  { %v1681_v23 = vpop.eup %1680 }
 0xb25   :  { %v884_v27 = vmul.f32 %v1681_v23, %v877_v25 }
 0xb27   :  { %1615 = vmatmul.mubr.f32.gmra.mxu1 %v884_v27 }
 0xbe7   :  { %v1616_v40 = vpop.f32.mrf.mxu1 }
 0xbe8   :  { %v991_v44 = vadd.f32 %v1616_v40, %v2164_v58 }
 0xbe9   :  { %v985_v48 = vpop.f32.mrf.mxu1 }
 0xbea   :  { %v1064_v13 = vmul.f32 -1.442695, %v991_v44  ;;  %v986_v29 = vadd.f32 %v2164_v58, %v985_v48 }
 0xbec   :  { %1682 = vpow2.f32 %v1064_v13  ;;  %v1063_v30 = vmul.f32 -1.442695, %v986_v29 }
 0xbee   :  { %1684 = vpow2.f32 %v1063_v30 }
 0xbf9   :  { %v1683_v32 = vpop.eup %1682 }
 0xbfa   :  { %v1025_v34 = vadd.f32 1.0, %v1683_v32 }
 0xbfb   :  { %v1685_v35 = vpop.eup %1684 }
 0xbfc   :  { %1686 = vrcp.f32 %v1025_v34  ;;  %v1024_v36 = vadd.f32 1.0, %v1685_v35 }
 0xbfe   :  { %1688 = vrcp.f32 %v1024_v36 }
 0xc09   :  { %v1687_v37 = vpop.eup %1686 }
 0xc0a   :  { %1049 = vst [vmem:[%s2209_s2 + $0x38] sm:$0xff] %v1687_v37 }
 0xc0b   :  { %v1689_v38 = vpop.eup %1688 }
 0xc0c   :  { %1048 = vst [vmem:[%s2209_s2 + $0x30] sm:$0xff] %v1689_v38 }
 0xc0d   :  { %1054 = vsyncpa [#allocation3], 1 }

</bundles_post_ra>
